<compile_context>
chip_gen: v7x
topology: tpu7x:2x2x1
jax: 0.10.0
libtpu: 0.0.40
codegen_flags: <defaults>
</compile_context>

<pallas_src>
import jax
import jax.numpy as jnp
from jax.experimental import pallas as pl
from jax.experimental.pallas import tpu as pltpu


def _round_up(x, m):
    return ((x + m - 1) // m) * m


def _critic_kernel(obs_ref, acts_ref,
                   w1_ref, b1_ref,
                   w2h_ref, w2a_ref, b2_ref,
                   w3_ref, b3_ref, w4_ref, b4_ref,
                   out_ref):
    """One batch tile, batch-on-lanes orientation.

    obs_ref : [obs_dim, TB]  (compute dtype)    acts_ref: [act_dim, TB]
    w1_ref  : [32, obs_dim]                     b1_ref  : [32, 1] f32
    w2h_ref : [8, 32]    w2a_ref: [8, act_dim]  b2_ref  : [8, 1] f32
    w3_ref  : [4, 8] f32 (SMEM)                 b3_ref  : [4] f32 (SMEM)
    w4_ref  : [4]    f32 (SMEM)                 b4_ref  : [1] f32 (SMEM)
    out_ref : [1, TB] f32   (lane-dense output slab)
    """
    obs_t = obs_ref[...]
    acts_t = acts_ref[...]

    # FC1 + ReLU  (MXU, f32 accumulation):  h1 = relu(W1 @ obs^T + b1)
    h1 = jnp.dot(w1_ref[...], obs_t, preferred_element_type=jnp.float32)
    h1 = jnp.maximum(h1 + b1_ref[...], 0.0)                      # [32, TB] f32

    # FC2 on cat([h1, acts], 1), expressed as a split matmul, + ReLU.
    h2 = (jnp.dot(w2h_ref[...], h1.astype(w2h_ref.dtype),
                  preferred_element_type=jnp.float32)
          + jnp.dot(w2a_ref[...], acts_t,
                    preferred_element_type=jnp.float32))
    h2 = jnp.maximum(h2 + b2_ref[...], 0.0)                      # [8, TB] f32

    # FC3 (8->4) + ReLU + FC4 (4->1) on the VPU (scalar weights from SMEM),
    # keeping the MXU free for the two wide dots above.
    hide3, hide2 = w3_ref.shape
    tb = h2.shape[1]
    h2_rows = [h2[k:k + 1, :] for k in range(hide2)]             # hide2 x [1, TB]
    out = jnp.full((1, tb), b4_ref[0], dtype=jnp.float32)
    for j in range(hide3):
        acc = jnp.full((1, tb), b3_ref[j], dtype=jnp.float32)
        for k in range(hide2):
            acc = acc + w3_ref[j, k] * h2_rows[k]
        out = out + w4_ref[j] * jnp.maximum(acc, 0.0)
    out_ref[...] = out.astype(out_ref.dtype)                     # [1, TB]


def critic_forward(obs, acts, params, *, compute_dtype=jnp.bfloat16, tile_b=2048):
    """obs: [B, obs_dim], acts: [B, act_dim]  ->  [B, 1] float32."""
    B, obs_dim = obs.shape
    act_dim = acts.shape[1]
    w1, b1, w2, b2, w3, b3, w4, b4 = (params[k] for k in
                                      ("w1", "b1", "w2", "b2", "w3", "b3", "w4", "b4"))
    hide = w1.shape[0]          # 32
    hide2 = w2.shape[0]         # 8
    hide3 = w3.shape[0]         # 4

    # Weights keep the PyTorch [out, in] layout: that is exactly W for W @ x^T.
    w1_c = w1.astype(compute_dtype)                   # [32, obs_dim]
    w2h_c = w2[:, :hide].astype(compute_dtype)        # [8, 32]       (acts on h1)
    w2a_c = w2[:, hide:].astype(compute_dtype)        # [8, act_dim]  (acts on acts)
    b1_c = b1.reshape(hide, 1).astype(jnp.float32)
    b2_c = b2.reshape(hide2, 1).astype(jnp.float32)
    # FC3/FC4 parameters live in SMEM as scalars for the VPU tail.
    w3_s = w3.astype(jnp.float32)                     # [4, 8]
    b3_s = b3.astype(jnp.float32)                     # [4]
    w4_s = w4.reshape(-1).astype(jnp.float32)         # [4]
    b4_s = b4.reshape(-1).astype(jnp.float32)         # [1]

    # Batch-on-lanes: transpose activations to [features, B] so intermediates
    # and the output are lane-dense.
    # TODO(synk): in a training loop, produce obs/acts directly in [feat, B]
    # layout (and pre-cast/pre-split the params once) to avoid this per-call
    # wrapper-side transpose pass over HBM.
    obs_t = obs.astype(compute_dtype).T               # [obs_dim, B]
    acts_t = acts.astype(compute_dtype).T             # [act_dim, B]

    tb = int(min(tile_b, _round_up(max(B, 1), 128)))  # lane-aligned tile
    bp = _round_up(B, tb)
    if bp != B:                                       # pad ragged batch tail
        obs_t = jnp.pad(obs_t, ((0, 0), (0, bp - B)))
        acts_t = jnp.pad(acts_t, ((0, 0), (0, bp - B)))
    grid = (bp // tb,)

    itemsize = jnp.dtype(compute_dtype).itemsize
    flops = 2 * B * (obs_dim * hide + (hide + act_dim) * hide2 + hide2 * hide3 + hide3)
    bytes_accessed = (bp * (obs_dim + act_dim) * itemsize            # inputs
                      + bp * 4                                        # output
                      + (w1_c.size + w2h_c.size + w2a_c.size) * itemsize
                      + (b1_c.size + b2_c.size + w3_s.size + b3_s.size
                         + w4_s.size + b4_s.size) * 4)

    smem = pltpu.MemorySpace.SMEM
    out_t = pl.pallas_call(
        _critic_kernel,
        out_shape=jax.ShapeDtypeStruct((1, bp), jnp.float32),
        grid=grid,
        in_specs=[
            # Batch-tiled, auto double-buffered inputs.
            pl.BlockSpec((obs_dim, tb), lambda i: (0, i)),
            pl.BlockSpec((act_dim, tb), lambda i: (0, i)),
            # Weights / biases: constant index map -> DMA'd once, VMEM-resident.
            pl.BlockSpec((hide, obs_dim), lambda i: (0, 0)),
            pl.BlockSpec((hide, 1), lambda i: (0, 0)),
            pl.BlockSpec((hide2, hide), lambda i: (0, 0)),
            pl.BlockSpec((hide2, act_dim), lambda i: (0, 0)),
            pl.BlockSpec((hide2, 1), lambda i: (0, 0)),
            # FC3/FC4 scalars in SMEM (whole arrays, untiled).
            pl.BlockSpec(memory_space=smem),
            pl.BlockSpec(memory_space=smem),
            pl.BlockSpec(memory_space=smem),
            pl.BlockSpec(memory_space=smem),
        ],
        out_specs=pl.BlockSpec((1, tb), lambda i: (0, i)),
        compiler_params=pltpu.CompilerParams(
            dimension_semantics=("parallel",),          # megacore on v7x
            vmem_limit_bytes=32 * 1024 * 1024,          # explicit; safe on v5e/v6e/v7x
        ),
        cost_estimate=pl.CostEstimate(flops=flops, transcendentals=0,
                                      bytes_accessed=bytes_accessed),
    )(obs_t, acts_t, w1_c, b1_c, w2h_c, w2a_c, b2_c, w3_s, b3_s, w4_s, b4_s)

    # [1, bp] lane-dense slab -> [B, 1] (free reshape after slicing off padding).
    return out_t[:, :B].reshape(B, 1)


def init_critic_params(key, n_agent, dim_observation, dim_action):
    """Deterministic PyTorch-Linear-style init: U(-1/sqrt(fan_in), 1/sqrt(fan_in))."""
    obs_dim = dim_observation * n_agent
    act_dim = dim_action * n_agent
    hide, hide2, hide3 = 32, 8, 4

    def linear(k, out_f, in_f):
        kw, kb = jax.random.split(k)
        bound = 1.0 / jnp.sqrt(in_f)
        w = jax.random.uniform(kw, (out_f, in_f), jnp.float32, -bound, bound)
        b = jax.random.uniform(kb, (out_f,), jnp.float32, -bound, bound)
        return w, b

    k1, k2, k3, k4 = jax.random.split(key, 4)
    w1, b1 = linear(k1, hide, obs_dim)
    w2, b2 = linear(k2, hide2, hide + act_dim)
    w3, b3 = linear(k3, hide3, hide2)
    w4, b4 = linear(k4, 1, hide3)
    return dict(w1=w1, b1=b1, w2=w2, b2=b2, w3=w3, b3=b3, w4=w4, b4=b4)


def critic_reference(obs, acts, params):
    """Pure-JAX reference matching the PyTorch forward semantics."""
    h1 = jax.nn.relu(obs @ params["w1"].T + params["b1"])
    combined = jnp.concatenate([h1, acts], axis=1)
    h2 = jax.nn.relu(combined @ params["w2"].T + params["b2"])
    h3 = jax.nn.relu(h2 @ params["w3"].T + params["b3"])
    return h3 @ params["w4"].T + params["b4"]


if __name__ == "__main__":
    # Small, module-consistent shapes.
    n_agent, dim_observation, dim_action = 2, 8, 4
    batch = 4
    obs_dim = dim_observation * n_agent     # 16
    act_dim = dim_action * n_agent          # 8

    key = jax.random.PRNGKey(0)
    k_params, k_obs, k_acts, k_obs2, k_acts2 = jax.random.split(key, 5)

    params = init_critic_params(k_params, n_agent, dim_observation, dim_action)
    obs = jax.random.normal(k_obs, (batch, obs_dim), jnp.float32)
    acts = jax.random.normal(k_acts, (batch, act_dim), jnp.float32)
    ref = critic_reference(obs, acts, params)

    # 1) Exact-semantics check (f32 compute path).
    out_f32 = jax.block_until_ready(
        critic_forward(obs, acts, params, compute_dtype=jnp.float32))
    assert out_f32.shape == (batch, 1), out_f32.shape
    assert jnp.allclose(out_f32, ref, atol=1e-5, rtol=1e-5), (out_f32, ref)

    # 2) Default fast path (bf16 inputs/weights, f32 accumulation) — loose check.
    out_bf16 = jax.block_until_ready(critic_forward(obs, acts, params))
    assert out_bf16.shape == (batch, 1), out_bf16.shape
    assert jnp.allclose(out_bf16, ref, atol=1e-1, rtol=1e-1), (out_bf16, ref)

    # 3) Multi-tile grid with a ragged batch (B not a multiple of the tile).
    batch2 = 300
    obs2 = jax.random.normal(k_obs2, (batch2, obs_dim), jnp.float32)
    acts2 = jax.random.normal(k_acts2, (batch2, act_dim), jnp.float32)
    out2 = jax.block_until_ready(
        critic_forward(obs2, acts2, params, compute_dtype=jnp.float32, tile_b=128))
    ref2 = critic_reference(obs2, acts2, params)
    assert out2.shape == (batch2, 1), out2.shape
    assert jnp.allclose(out2, ref2, atol=1e-5, rtol=1e-5)

    print("KERNEL_OK")
</pallas_src>

<mosaic_0001>
module attributes {stable_mosaic.version = 11 : i64} {
  func.func @_critic_kernel(%arg0: i32, %arg1: memref<16x128xf32, #tpu.memory_space<vmem>>, %arg2: memref<8x128xf32, #tpu.memory_space<vmem>>, %arg3: memref<32x16xf32, #tpu.memory_space<vmem>>, %arg4: memref<32x1xf32, #tpu.memory_space<vmem>>, %arg5: memref<8x32xf32, #tpu.memory_space<vmem>>, %arg6: memref<8x8xf32, #tpu.memory_space<vmem>>, %arg7: memref<8x1xf32, #tpu.memory_space<vmem>>, %arg8: memref<4x8xf32, #tpu.memory_space<smem>>, %arg9: memref<4xf32, #tpu.memory_space<smem>>, %arg10: memref<4xf32, #tpu.memory_space<smem>>, %arg11: memref<1xf32, #tpu.memory_space<smem>>, %arg12: memref<1x128xf32, #tpu.memory_space<vmem>>) attributes {dimension_semantics = [#tpu.dimension_semantics<parallel>], iteration_bounds = array<i64: 1>, scalar_prefetch = 0 : i64, scratch_operands = 0 : i64, tpu.core_type = #tpu.core_type<tc>, window_params = [{transform_indices = @transform_0, window_bounds = array<i64: 16, 128>}, {transform_indices = @transform_1, window_bounds = array<i64: 8, 128>}, {pipeline_mode = #tpu.pipeline_mode<synchronous>, transform_indices = @transform_2, window_bounds = array<i64: 32, 16>}, {pipeline_mode = #tpu.pipeline_mode<synchronous>, transform_indices = @transform_3, window_bounds = array<i64: 32, 1>}, {pipeline_mode = #tpu.pipeline_mode<synchronous>, transform_indices = @transform_4, window_bounds = array<i64: 8, 32>}, {pipeline_mode = #tpu.pipeline_mode<synchronous>, transform_indices = @transform_5, window_bounds = array<i64: 8, 8>}, {pipeline_mode = #tpu.pipeline_mode<synchronous>, transform_indices = @transform_6, window_bounds = array<i64: 8, 1>}, {transform_indices = @transform_7, window_bounds = array<i64: 4, 8>}, {transform_indices = @transform_8, window_bounds = array<i64: 4>}, {transform_indices = @transform_9, window_bounds = array<i64: 4>}, {transform_indices = @transform_10, window_bounds = array<i64: 1>}, {transform_indices = @transform_11, window_bounds = array<i64: 1, 128>}]} {
    %c0 = arith.constant 0 : index
    %c0_0 = arith.constant 0 : index
    %0 = vector.load %arg1[%c0, %c0_0] : memref<16x128xf32, #tpu.memory_space<vmem>>, vector<16x128xf32>
    %c0_1 = arith.constant 0 : index
    %c0_2 = arith.constant 0 : index
    %1 = vector.load %arg2[%c0_1, %c0_2] : memref<8x128xf32, #tpu.memory_space<vmem>>, vector<8x128xf32>
    %c0_3 = arith.constant 0 : index
    %c0_4 = arith.constant 0 : index
    %2 = vector.load %arg3[%c0_3, %c0_4] : memref<32x16xf32, #tpu.memory_space<vmem>>, vector<32x16xf32>
    %cst = arith.constant dense<0.000000e+00> : vector<32x128xf32>
    %3 = tpu.matmul %2, %0, %cst {dimension_numbers = #tpu.dot_dimension_numbers<[1], [0], [0], [1], [0, 0, 1, 1], [], []>} : vector<32x16xf32>, vector<16x128xf32>, vector<32x128xf32> -> vector<32x128xf32>
    %c0_5 = arith.constant 0 : index
    %c0_6 = arith.constant 0 : index
    %4 = vector.load %arg4[%c0_5, %c0_6] : memref<32x1xf32, #tpu.memory_space<vmem>>, vector<32x1xf32>
    %5 = vector.broadcast %4 : vector<32x1xf32> to vector<32x128xf32>
    %6 = arith.addf %3, %5 : vector<32x128xf32>
    %cst_7 = arith.constant 0.000000e+00 : f32
    %7 = vector.broadcast %cst_7 : f32 to vector<32x128xf32>
    %8 = arith.maximumf %6, %7 : vector<32x128xf32>
    %c0_8 = arith.constant 0 : index
    %c0_9 = arith.constant 0 : index
    %9 = vector.load %arg5[%c0_8, %c0_9] : memref<8x32xf32, #tpu.memory_space<vmem>>, vector<8x32xf32>
    %cst_10 = arith.constant dense<0.000000e+00> : vector<8x128xf32>
    %10 = tpu.matmul %9, %8, %cst_10 {dimension_numbers = #tpu.dot_dimension_numbers<[1], [0], [0], [1], [0, 0, 1, 1], [], []>} : vector<8x32xf32>, vector<32x128xf32>, vector<8x128xf32> -> vector<8x128xf32>
    %c0_11 = arith.constant 0 : index
    %c0_12 = arith.constant 0 : index
    %11 = vector.load %arg6[%c0_11, %c0_12] : memref<8x8xf32, #tpu.memory_space<vmem>>, vector<8x8xf32>
    %cst_13 = arith.constant dense<0.000000e+00> : vector<8x128xf32>
    %12 = tpu.matmul %11, %1, %cst_13 {dimension_numbers = #tpu.dot_dimension_numbers<[1], [0], [0], [1], [0, 0, 1, 1], [], []>} : vector<8x8xf32>, vector<8x128xf32>, vector<8x128xf32> -> vector<8x128xf32>
    %13 = arith.addf %10, %12 : vector<8x128xf32>
    %c0_14 = arith.constant 0 : index
    %c0_15 = arith.constant 0 : index
    %14 = vector.load %arg7[%c0_14, %c0_15] : memref<8x1xf32, #tpu.memory_space<vmem>>, vector<8x1xf32>
    %15 = vector.broadcast %14 : vector<8x1xf32> to vector<8x128xf32>
    %16 = arith.addf %13, %15 : vector<8x128xf32>
    %cst_16 = arith.constant 0.000000e+00 : f32
    %17 = vector.broadcast %cst_16 : f32 to vector<8x128xf32>
    %18 = arith.maximumf %16, %17 : vector<8x128xf32>
    %19 = vector.extract_strided_slice %18 {offsets = [0, 0], sizes = [1, 128], strides = [1, 1]} : vector<8x128xf32> to vector<1x128xf32>
    %20 = vector.extract_strided_slice %18 {offsets = [1, 0], sizes = [1, 128], strides = [1, 1]} : vector<8x128xf32> to vector<1x128xf32>
    %21 = vector.extract_strided_slice %18 {offsets = [2, 0], sizes = [1, 128], strides = [1, 1]} : vector<8x128xf32> to vector<1x128xf32>
    %22 = vector.extract_strided_slice %18 {offsets = [3, 0], sizes = [1, 128], strides = [1, 1]} : vector<8x128xf32> to vector<1x128xf32>
    %23 = vector.extract_strided_slice %18 {offsets = [4, 0], sizes = [1, 128], strides = [1, 1]} : vector<8x128xf32> to vector<1x128xf32>
    %24 = vector.extract_strided_slice %18 {offsets = [5, 0], sizes = [1, 128], strides = [1, 1]} : vector<8x128xf32> to vector<1x128xf32>
    %25 = vector.extract_strided_slice %18 {offsets = [6, 0], sizes = [1, 128], strides = [1, 1]} : vector<8x128xf32> to vector<1x128xf32>
    %26 = vector.extract_strided_slice %18 {offsets = [7, 0], sizes = [1, 128], strides = [1, 1]} : vector<8x128xf32> to vector<1x128xf32>
    %c0_17 = arith.constant 0 : index
    %27 = memref.load %arg11[%c0_17] : memref<1xf32, #tpu.memory_space<smem>>
    %28 = vector.broadcast %27 : f32 to vector<1x128xf32>
    %c0_18 = arith.constant 0 : index
    %29 = memref.load %arg9[%c0_18] : memref<4xf32, #tpu.memory_space<smem>>
    %30 = vector.broadcast %29 : f32 to vector<1x128xf32>
    %c0_19 = arith.constant 0 : index
    %c0_20 = arith.constant 0 : index
    %31 = memref.load %arg8[%c0_19, %c0_20] : memref<4x8xf32, #tpu.memory_space<smem>>
    %32 = vector.broadcast %31 : f32 to vector<1x128xf32>
    %33 = arith.mulf %32, %19 : vector<1x128xf32>
    %34 = arith.addf %30, %33 : vector<1x128xf32>
    %c0_21 = arith.constant 0 : index
    %c1 = arith.constant 1 : index
    %35 = memref.load %arg8[%c0_21, %c1] : memref<4x8xf32, #tpu.memory_space<smem>>
    %36 = vector.broadcast %35 : f32 to vector<1x128xf32>
    %37 = arith.mulf %36, %20 : vector<1x128xf32>
    %38 = arith.addf %34, %37 : vector<1x128xf32>
    %c0_22 = arith.constant 0 : index
    %c2 = arith.constant 2 : index
    %39 = memref.load %arg8[%c0_22, %c2] : memref<4x8xf32, #tpu.memory_space<smem>>
    %40 = vector.broadcast %39 : f32 to vector<1x128xf32>
    %41 = arith.mulf %40, %21 : vector<1x128xf32>
    %42 = arith.addf %38, %41 : vector<1x128xf32>
    %c0_23 = arith.constant 0 : index
    %c3 = arith.constant 3 : index
    %43 = memref.load %arg8[%c0_23, %c3] : memref<4x8xf32, #tpu.memory_space<smem>>
    %44 = vector.broadcast %43 : f32 to vector<1x128xf32>
    %45 = arith.mulf %44, %22 : vector<1x128xf32>
    %46 = arith.addf %42, %45 : vector<1x128xf32>
    %c0_24 = arith.constant 0 : index
    %c4 = arith.constant 4 : index
    %47 = memref.load %arg8[%c0_24, %c4] : memref<4x8xf32, #tpu.memory_space<smem>>
    %48 = vector.broadcast %47 : f32 to vector<1x128xf32>
    %49 = arith.mulf %48, %23 : vector<1x128xf32>
    %50 = arith.addf %46, %49 : vector<1x128xf32>
    %c0_25 = arith.constant 0 : index
    %c5 = arith.constant 5 : index
    %51 = memref.load %arg8[%c0_25, %c5] : memref<4x8xf32, #tpu.memory_space<smem>>
    %52 = vector.broadcast %51 : f32 to vector<1x128xf32>
    %53 = arith.mulf %52, %24 : vector<1x128xf32>
    %54 = arith.addf %50, %53 : vector<1x128xf32>
    %c0_26 = arith.constant 0 : index
    %c6 = arith.constant 6 : index
    %55 = memref.load %arg8[%c0_26, %c6] : memref<4x8xf32, #tpu.memory_space<smem>>
    %56 = vector.broadcast %55 : f32 to vector<1x128xf32>
    %57 = arith.mulf %56, %25 : vector<1x128xf32>
    %58 = arith.addf %54, %57 : vector<1x128xf32>
    %c0_27 = arith.constant 0 : index
    %c7 = arith.constant 7 : index
    %59 = memref.load %arg8[%c0_27, %c7] : memref<4x8xf32, #tpu.memory_space<smem>>
    %60 = vector.broadcast %59 : f32 to vector<1x128xf32>
    %61 = arith.mulf %60, %26 : vector<1x128xf32>
    %62 = arith.addf %58, %61 : vector<1x128xf32>
    %c0_28 = arith.constant 0 : index
    %63 = memref.load %arg10[%c0_28] : memref<4xf32, #tpu.memory_space<smem>>
    %cst_29 = arith.constant 0.000000e+00 : f32
    %64 = vector.broadcast %cst_29 : f32 to vector<1x128xf32>
    %65 = arith.maximumf %62, %64 : vector<1x128xf32>
    %66 = vector.broadcast %63 : f32 to vector<1x128xf32>
    %67 = arith.mulf %66, %65 : vector<1x128xf32>
    %68 = arith.addf %28, %67 : vector<1x128xf32>
    %c1_30 = arith.constant 1 : index
    %69 = memref.load %arg9[%c1_30] : memref<4xf32, #tpu.memory_space<smem>>
    %70 = vector.broadcast %69 : f32 to vector<1x128xf32>
    %c1_31 = arith.constant 1 : index
    %c0_32 = arith.constant 0 : index
    %71 = memref.load %arg8[%c1_31, %c0_32] : memref<4x8xf32, #tpu.memory_space<smem>>
    %72 = vector.broadcast %71 : f32 to vector<1x128xf32>
    %73 = arith.mulf %72, %19 : vector<1x128xf32>
    %74 = arith.addf %70, %73 : vector<1x128xf32>
    %c1_33 = arith.constant 1 : index
    %c1_34 = arith.constant 1 : index
    %75 = memref.load %arg8[%c1_33, %c1_34] : memref<4x8xf32, #tpu.memory_space<smem>>
    %76 = vector.broadcast %75 : f32 to vector<1x128xf32>
    %77 = arith.mulf %76, %20 : vector<1x128xf32>
    %78 = arith.addf %74, %77 : vector<1x128xf32>
    %c1_35 = arith.constant 1 : index
    %c2_36 = arith.constant 2 : index
    %79 = memref.load %arg8[%c1_35, %c2_36] : memref<4x8xf32, #tpu.memory_space<smem>>
    %80 = vector.broadcast %79 : f32 to vector<1x128xf32>
    %81 = arith.mulf %80, %21 : vector<1x128xf32>
    %82 = arith.addf %78, %81 : vector<1x128xf32>
    %c1_37 = arith.constant 1 : index
    %c3_38 = arith.constant 3 : index
    %83 = memref.load %arg8[%c1_37, %c3_38] : memref<4x8xf32, #tpu.memory_space<smem>>
    %84 = vector.broadcast %83 : f32 to vector<1x128xf32>
    %85 = arith.mulf %84, %22 : vector<1x128xf32>
    %86 = arith.addf %82, %85 : vector<1x128xf32>
    %c1_39 = arith.constant 1 : index
    %c4_40 = arith.constant 4 : index
    %87 = memref.load %arg8[%c1_39, %c4_40] : memref<4x8xf32, #tpu.memory_space<smem>>
    %88 = vector.broadcast %87 : f32 to vector<1x128xf32>
    %89 = arith.mulf %88, %23 : vector<1x128xf32>
    %90 = arith.addf %86, %89 : vector<1x128xf32>
    %c1_41 = arith.constant 1 : index
    %c5_42 = arith.constant 5 : index
    %91 = memref.load %arg8[%c1_41, %c5_42] : memref<4x8xf32, #tpu.memory_space<smem>>
    %92 = vector.broadcast %91 : f32 to vector<1x128xf32>
    %93 = arith.mulf %92, %24 : vector<1x128xf32>
    %94 = arith.addf %90, %93 : vector<1x128xf32>
    %c1_43 = arith.constant 1 : index
    %c6_44 = arith.constant 6 : index
    %95 = memref.load %arg8[%c1_43, %c6_44] : memref<4x8xf32, #tpu.memory_space<smem>>
    %96 = vector.broadcast %95 : f32 to vector<1x128xf32>
    %97 = arith.mulf %96, %25 : vector<1x128xf32>
    %98 = arith.addf %94, %97 : vector<1x128xf32>
    %c1_45 = arith.constant 1 : index
    %c7_46 = arith.constant 7 : index
    %99 = memref.load %arg8[%c1_45, %c7_46] : memref<4x8xf32, #tpu.memory_space<smem>>
    %100 = vector.broadcast %99 : f32 to vector<1x128xf32>
    %101 = arith.mulf %100, %26 : vector<1x128xf32>
    %102 = arith.addf %98, %101 : vector<1x128xf32>
    %c1_47 = arith.constant 1 : index
    %103 = memref.load %arg10[%c1_47] : memref<4xf32, #tpu.memory_space<smem>>
    %cst_48 = arith.constant 0.000000e+00 : f32
    %104 = vector.broadcast %cst_48 : f32 to vector<1x128xf32>
    %105 = arith.maximumf %102, %104 : vector<1x128xf32>
    %106 = vector.broadcast %103 : f32 to vector<1x128xf32>
    %107 = arith.mulf %106, %105 : vector<1x128xf32>
    %108 = arith.addf %68, %107 : vector<1x128xf32>
    %c2_49 = arith.constant 2 : index
    %109 = memref.load %arg9[%c2_49] : memref<4xf32, #tpu.memory_space<smem>>
    %110 = vector.broadcast %109 : f32 to vector<1x128xf32>
    %c2_50 = arith.constant 2 : index
    %c0_51 = arith.constant 0 : index
    %111 = memref.load %arg8[%c2_50, %c0_51] : memref<4x8xf32, #tpu.memory_space<smem>>
    %112 = vector.broadcast %111 : f32 to vector<1x128xf32>
    %113 = arith.mulf %112, %19 : vector<1x128xf32>
    %114 = arith.addf %110, %113 : vector<1x128xf32>
    %c2_52 = arith.constant 2 : index
    %c1_53 = arith.constant 1 : index
    %115 = memref.load %arg8[%c2_52, %c1_53] : memref<4x8xf32, #tpu.memory_space<smem>>
    %116 = vector.broadcast %115 : f32 to vector<1x128xf32>
    %117 = arith.mulf %116, %20 : vector<1x128xf32>
    %118 = arith.addf %114, %117 : vector<1x128xf32>
    %c2_54 = arith.constant 2 : index
    %c2_55 = arith.constant 2 : index
    %119 = memref.load %arg8[%c2_54, %c2_55] : memref<4x8xf32, #tpu.memory_space<smem>>
    %120 = vector.broadcast %119 : f32 to vector<1x128xf32>
    %121 = arith.mulf %120, %21 : vector<1x128xf32>
    %122 = arith.addf %118, %121 : vector<1x128xf32>
    %c2_56 = arith.constant 2 : index
    %c3_57 = arith.constant 3 : index
    %123 = memref.load %arg8[%c2_56, %c3_57] : memref<4x8xf32, #tpu.memory_space<smem>>
    %124 = vector.broadcast %123 : f32 to vector<1x128xf32>
    %125 = arith.mulf %124, %22 : vector<1x128xf32>
    %126 = arith.addf %122, %125 : vector<1x128xf32>
    %c2_58 = arith.constant 2 : index
    %c4_59 = arith.constant 4 : index
    %127 = memref.load %arg8[%c2_58, %c4_59] : memref<4x8xf32, #tpu.memory_space<smem>>
    %128 = vector.broadcast %127 : f32 to vector<1x128xf32>
    %129 = arith.mulf %128, %23 : vector<1x128xf32>
    %130 = arith.addf %126, %129 : vector<1x128xf32>
    %c2_60 = arith.constant 2 : index
    %c5_61 = arith.constant 5 : index
    %131 = memref.load %arg8[%c2_60, %c5_61] : memref<4x8xf32, #tpu.memory_space<smem>>
    %132 = vector.broadcast %131 : f32 to vector<1x128xf32>
    %133 = arith.mulf %132, %24 : vector<1x128xf32>
    %134 = arith.addf %130, %133 : vector<1x128xf32>
    %c2_62 = arith.constant 2 : index
    %c6_63 = arith.constant 6 : index
    %135 = memref.load %arg8[%c2_62, %c6_63] : memref<4x8xf32, #tpu.memory_space<smem>>
    %136 = vector.broadcast %135 : f32 to vector<1x128xf32>
    %137 = arith.mulf %136, %25 : vector<1x128xf32>
    %138 = arith.addf %134, %137 : vector<1x128xf32>
    %c2_64 = arith.constant 2 : index
    %c7_65 = arith.constant 7 : index
    %139 = memref.load %arg8[%c2_64, %c7_65] : memref<4x8xf32, #tpu.memory_space<smem>>
    %140 = vector.broadcast %139 : f32 to vector<1x128xf32>
    %141 = arith.mulf %140, %26 : vector<1x128xf32>
    %142 = arith.addf %138, %141 : vector<1x128xf32>
    %c2_66 = arith.constant 2 : index
    %143 = memref.load %arg10[%c2_66] : memref<4xf32, #tpu.memory_space<smem>>
    %cst_67 = arith.constant 0.000000e+00 : f32
    %144 = vector.broadcast %cst_67 : f32 to vector<1x128xf32>
    %145 = arith.maximumf %142, %144 : vector<1x128xf32>
    %146 = vector.broadcast %143 : f32 to vector<1x128xf32>
    %147 = arith.mulf %146, %145 : vector<1x128xf32>
    %148 = arith.addf %108, %147 : vector<1x128xf32>
    %c3_68 = arith.constant 3 : index
    %149 = memref.load %arg9[%c3_68] : memref<4xf32, #tpu.memory_space<smem>>
    %150 = vector.broadcast %149 : f32 to vector<1x128xf32>
    %c3_69 = arith.constant 3 : index
    %c0_70 = arith.constant 0 : index
    %151 = memref.load %arg8[%c3_69, %c0_70] : memref<4x8xf32, #tpu.memory_space<smem>>
    %152 = vector.broadcast %151 : f32 to vector<1x128xf32>
    %153 = arith.mulf %152, %19 : vector<1x128xf32>
    %154 = arith.addf %150, %153 : vector<1x128xf32>
    %c3_71 = arith.constant 3 : index
    %c1_72 = arith.constant 1 : index
    %155 = memref.load %arg8[%c3_71, %c1_72] : memref<4x8xf32, #tpu.memory_space<smem>>
    %156 = vector.broadcast %155 : f32 to vector<1x128xf32>
    %157 = arith.mulf %156, %20 : vector<1x128xf32>
    %158 = arith.addf %154, %157 : vector<1x128xf32>
    %c3_73 = arith.constant 3 : index
    %c2_74 = arith.constant 2 : index
    %159 = memref.load %arg8[%c3_73, %c2_74] : memref<4x8xf32, #tpu.memory_space<smem>>
    %160 = vector.broadcast %159 : f32 to vector<1x128xf32>
    %161 = arith.mulf %160, %21 : vector<1x128xf32>
    %162 = arith.addf %158, %161 : vector<1x128xf32>
    %c3_75 = arith.constant 3 : index
    %c3_76 = arith.constant 3 : index
    %163 = memref.load %arg8[%c3_75, %c3_76] : memref<4x8xf32, #tpu.memory_space<smem>>
    %164 = vector.broadcast %163 : f32 to vector<1x128xf32>
    %165 = arith.mulf %164, %22 : vector<1x128xf32>
    %166 = arith.addf %162, %165 : vector<1x128xf32>
    %c3_77 = arith.constant 3 : index
    %c4_78 = arith.constant 4 : index
    %167 = memref.load %arg8[%c3_77, %c4_78] : memref<4x8xf32, #tpu.memory_space<smem>>
    %168 = vector.broadcast %167 : f32 to vector<1x128xf32>
    %169 = arith.mulf %168, %23 : vector<1x128xf32>
    %170 = arith.addf %166, %169 : vector<1x128xf32>
    %c3_79 = arith.constant 3 : index
    %c5_80 = arith.constant 5 : index
    %171 = memref.load %arg8[%c3_79, %c5_80] : memref<4x8xf32, #tpu.memory_space<smem>>
    %172 = vector.broadcast %171 : f32 to vector<1x128xf32>
    %173 = arith.mulf %172, %24 : vector<1x128xf32>
    %174 = arith.addf %170, %173 : vector<1x128xf32>
    %c3_81 = arith.constant 3 : index
    %c6_82 = arith.constant 6 : index
    %175 = memref.load %arg8[%c3_81, %c6_82] : memref<4x8xf32, #tpu.memory_space<smem>>
    %176 = vector.broadcast %175 : f32 to vector<1x128xf32>
    %177 = arith.mulf %176, %25 : vector<1x128xf32>
    %178 = arith.addf %174, %177 : vector<1x128xf32>
    %c3_83 = arith.constant 3 : index
    %c7_84 = arith.constant 7 : index
    %179 = memref.load %arg8[%c3_83, %c7_84] : memref<4x8xf32, #tpu.memory_space<smem>>
    %180 = vector.broadcast %179 : f32 to vector<1x128xf32>
    %181 = arith.mulf %180, %26 : vector<1x128xf32>
    %182 = arith.addf %178, %181 : vector<1x128xf32>
    %c3_85 = arith.constant 3 : index
    %183 = memref.load %arg10[%c3_85] : memref<4xf32, #tpu.memory_space<smem>>
    %cst_86 = arith.constant 0.000000e+00 : f32
    %184 = vector.broadcast %cst_86 : f32 to vector<1x128xf32>
    %185 = arith.maximumf %182, %184 : vector<1x128xf32>
    %186 = vector.broadcast %183 : f32 to vector<1x128xf32>
    %187 = arith.mulf %186, %185 : vector<1x128xf32>
    %188 = arith.addf %148, %187 : vector<1x128xf32>
    %c0_87 = arith.constant 0 : index
    %c0_88 = arith.constant 0 : index
    %189 = vector.load %arg12[%c0_87, %c0_88] : memref<1x128xf32, #tpu.memory_space<vmem>>, vector<1x128xf32>
    tpu.vector_store %arg12[%c0_87, %c0_88], %188 {strides = array<i32>} : memref<1x128xf32, #tpu.memory_space<vmem>>, vector<1x128xf32>,
    return
  }
  func.func @transform_0(%arg0: i32) -> (i32, i32) {
    %c0_i32 = arith.constant 0 : i32
    %c0_i32_0 = arith.constant 0 : i32
    return %c0_i32, %arg0 : i32, i32
  }
  func.func @transform_1(%arg0: i32) -> (i32, i32) {
    %c0_i32 = arith.constant 0 : i32
    %c0_i32_0 = arith.constant 0 : i32
    return %c0_i32, %arg0 : i32, i32
  }
  func.func @transform_2(%arg0: i32) -> (i32, i32) {
    %c0_i32 = arith.constant 0 : i32
    %c0_i32_0 = arith.constant 0 : i32
    %c0_i32_1 = arith.constant 0 : i32
    return %c0_i32, %c0_i32_0 : i32, i32
  }
  func.func @transform_3(%arg0: i32) -> (i32, i32) {
    %c0_i32 = arith.constant 0 : i32
    %c0_i32_0 = arith.constant 0 : i32
    %c0_i32_1 = arith.constant 0 : i32
    return %c0_i32, %c0_i32_0 : i32, i32
  }
  func.func @transform_4(%arg0: i32) -> (i32, i32) {
    %c0_i32 = arith.constant 0 : i32
    %c0_i32_0 = arith.constant 0 : i32
    %c0_i32_1 = arith.constant 0 : i32
    return %c0_i32, %c0_i32_0 : i32, i32
  }
  func.func @transform_5(%arg0: i32) -> (i32, i32) {
    %c0_i32 = arith.constant 0 : i32
    %c0_i32_0 = arith.constant 0 : i32
    %c0_i32_1 = arith.constant 0 : i32
    return %c0_i32, %c0_i32_0 : i32, i32
  }
  func.func @transform_6(%arg0: i32) -> (i32, i32) {
    %c0_i32 = arith.constant 0 : i32
    %c0_i32_0 = arith.constant 0 : i32
    %c0_i32_1 = arith.constant 0 : i32
    return %c0_i32, %c0_i32_0 : i32, i32
  }
  func.func @transform_7(%arg0: i32) -> (i32, i32) {
    %c0_i32 = arith.constant 0 : i32
    %c0_i32_0 = arith.constant 0 : i32
    %c0_i32_1 = arith.constant 0 : i32
    return %c0_i32, %c0_i32_0 : i32, i32
  }
  func.func @transform_8(%arg0: i32) -> i32 {
    %c0_i32 = arith.constant 0 : i32
    %c0_i32_0 = arith.constant 0 : i32
    return %c0_i32 : i32
  }
  func.func @transform_9(%arg0: i32) -> i32 {
    %c0_i32 = arith.constant 0 : i32
    %c0_i32_0 = arith.constant 0 : i32
    return %c0_i32 : i32
  }
  func.func @transform_10(%arg0: i32) -> i32 {
    %c0_i32 = arith.constant 0 : i32
    %c0_i32_0 = arith.constant 0 : i32
    return %c0_i32 : i32
  }
  func.func @transform_11(%arg0: i32) -> (i32, i32) {
    %c0_i32 = arith.constant 0 : i32
    %c0_i32_0 = arith.constant 0 : i32
    return %c0_i32, %arg0 : i32, i32
  }
}

</mosaic_0001>

<bundles_post_ra>
// kernel: tpu_custom_call.1
= control target key start
LH: loop header
LB: loop body
LE: loop exit
PB: predicated region body
PF: predicated region fallthrough
CT: control target
= control target key end

     0   :  { %s1099_s0 = inlined_call_operand.vmem [shape: f32[16,128], index: 0, kind: input, shape index: {}]   ;;  %s1100_s1 = inlined_call_operand.vmem [shape: f32[8,128], index: 1, kind: input, shape index: {}]   ;;  %s1101_s2 = inlined_call_operand.vmem [shape: f32[32,16], index: 2, kind: input, shape index: {}]   ;;  %s1102_s3 = inlined_call_operand.vmem [shape: f32[32,1], index: 3, kind: input, shape index: {}]   ;;  %s1103_s4 = inlined_call_operand.vmem [shape: f32[8,32], index: 4, kind: input, shape index: {}]   ;;  %s1104_s5 = inlined_call_operand.vmem [shape: f32[8,8], index: 5, kind: input, shape index: {}]   ;;  %s1105_s6 = inlined_call_operand.vmem [shape: f32[8,1], index: 6, kind: input, shape index: {}]   ;;  %s1106_s7 = inlined_call_operand.vmem [shape: f32[4,8], index: 7, kind: input, shape index: {}]   ;;  %s1107_s8 = inlined_call_operand.vmem [shape: f32[4], index: 8, kind: input, shape index: {}]   ;;  %s1108_s9 = inlined_call_operand.vmem [shape: f32[4], index: 9, kind: input, shape index: {}]   ;;  %s1109_s10 = inlined_call_operand.<no memory space> [shape: f32[1], index: 10, kind: input, shape index: {}]   ;;  %s1110_s11 = inlined_call_operand.hbm [shape: f32[1,128], index: 11, kind: output, shape index: {}]  }
   0x1   :  { %1113 = sst [smem:[#allocation14_spill]] %s1109_s10 }
   0x2   :  { %1114 = sst [smem:[#allocation15_spill]] %s1110_s11 }
   0x3   :  { %17 = vsyncpa [#allocation5], 0 }
   0x4   :  { %18 = vsyncpa [#allocation7], 0  ;;  %s50_s19 = sshll.u32 %s1107_s8, 4  ;;  %s51_s19 = int_to_ptr.vmem [resolvable:$true] %s50_s19 }
   0x5   :  { %19 = vsyncpa [#allocation4], 0  ;;  %s40_s22 = sshll.u32 %s1106_s7, 4  ;;  %s728_s23 = scalar_lea.vmem %s51_s19, 16  ;;  %s41_s22 = int_to_ptr.vmem [resolvable:$true] %s40_s22 }
   0x6   :  { %p729_p0 = scmp.ne.s32.totalorder %s51_s19, %s728_s23  ;;  %p733_p1 = scmp.lt.s32.totalorder %s51_s19, %s51_s19 }
   0x7   :  { %p734_p2 = scmp.lt.s32.totalorder %s728_s23, %s728_s23 }
   0x9   :  { %p735_p3 = por %p734_p2, %p733_p1 }
   0xb   :  { %p736_p4 = pnand %p735_p3, %p729_p0 }
   0xd   :  { %739 = shalt.err (!%p736_p4)
}
   0xe   :  { %s792_s24 = smov [#allocation6]   ;;  %s740_s25 = scalar_lea.vmem %s41_s22, 64 }
   0xf   :  { %53 = dma.vmem_to_smem %s51_s19, 16, %s792_s24, [#allocation7]  }
  0x10   :  { %p741_p5 = scmp.ne.s32.totalorder %s41_s22, %s740_s25  ;;  %p745_p6 = scmp.lt.s32.totalorder %s41_s22, %s41_s22 }
  0x11   :  { %p746_p7 = scmp.lt.s32.totalorder %s740_s25, %s740_s25 }
  0x13   :  { %p747_p8 = por %p746_p7, %p745_p6 }
  0x15   :  { %p748_p9 = pnand %p747_p8, %p741_p5 }
  0x17   :  { %751 = shalt.err (!%p748_p9)
}
  0x18   :  { %s793_s8 = smov [#allocation3]   ;;  %s60_s27 = sshll.u32 %s1108_s9, 4  ;;  %s61_s27 = int_to_ptr.vmem [resolvable:$true] %s60_s27 }
  0x19   :  { %43 = dma.vmem_to_smem %s41_s22, 64, %s793_s8, [#allocation5]  }
  0x1a   :  { %s752_s28 = scalar_lea.vmem %s61_s27, 16  ;;  %p757_p11 = scmp.lt.s32.totalorder %s61_s27, %s61_s27 }
  0x1b   :  { %p753_p10 = scmp.ne.s32.totalorder %s61_s27, %s752_s28  ;;  %p758_p12 = scmp.lt.s32.totalorder %s752_s28, %s752_s28 }
  0x1d   :  { %p759_p13 = por %p758_p12, %p757_p11 }
  0x1f   :  { %p760_p0 = pnand %p759_p13, %p753_p10 }
  0x21   :  { %763 = shalt.err (!%p760_p0)
}
  0x22   :  { %s794_s29 = smov [#allocation8]  }
  0x23   :  { %63 = dma.vmem_to_smem %s61_s27, 16, %s794_s29, [#allocation7]  }
  0x24   :  { %786 = dma.done.wait [#allocation5], 64  }
  0x25   :  { %787 = vsyncadd [#allocation5], 4294967232 }
  0x26   :  { %788 = dma.done.wait [#allocation7], 32  }
  0x27   :  { %789 = vsyncadd [#allocation7], 4294967264 }
  0x28   :  { %75 = sfence }
  0x29   :  { %v76_v0 = vld [vmem:[%s1099_s0] sm:$0xff]  ;;  %v77_v1 = vld [vmem:[%s1099_s0 + $0x8] sm:$0xff]  ;;  %vm107_vm0 = vcmask 130048   ;;  %v795_v4 = vmov 0   ;;  %v85_v6 = vld [vmem:[%s1102_s3 + $0x10] sm:$0xff]  ;;  %v796_v13 = vmov 0.0  }
  0x2a   :  { %v79_v2 = vld [vmem:[%s1101_s2] sm:$0xff]  ;;  %v708_v3 = vpack.c.bf16 %v77_v1, %v76_v0  ;;  %726 = vset.pattern.permute.xlu0 %v795_v4  ;;  %727 = vset.pattern.permute.xlu1 %v795_v4  ;;  %v80_v7 = vld [vmem:[%s1101_s2 + $0x8] sm:$0xff]  ;;  %v81_v9 = vld [vmem:[%s1101_s2 + $0x10] sm:$0xff]  ;;  %vm797_vm1 = vmmov 0   ;;  %vm211_vm2 = vcmask 64512   ;;  %v798_v16 = vmov 0.0|0.0  }
  0x2b   :  { %686 = vmatprep.mubr.msk.f32.mxu0 %vm107_vm0, %v79_v2  ;;  %v83_v5 = vld [vmem:[%s1102_s3] sm:$0xff]  ;;  %v84_v8 = vld [vmem:[%s1102_s3 + $0x8] sm:$0xff]  ;;  %99 = vperm.xlu1 %727, %v85_v6   ;;  %v86_v10 = vld [vmem:[%s1102_s3 + $0x18] sm:$0xff]  ;;  %vm285_vm3 = vcmask 261120   ;;  %s919_s9 = sld [smem:[#allocation3 + $0x2]]  ;;  %s921_s13 = sld [smem:[#allocation3 + $0x3]] }
  0x2c   :  { %709 = vmatprep.subr.bf16.mxu0 %v708_v3  ;;  %89 = vperm.xlu0 %726, %v83_v5   ;;  %v82_v11 = vld [vmem:[%s1101_s2 + $0x18] sm:$0xff]  ;;  %v359_v12 = vld [vmem:[%s1105_s6] sm:$0xff]  ;;  %s917_s6 = sld [smem:[#allocation3 + $0x1]]  ;;  %s923_s14 = sld [smem:[#allocation6]] }
  0x2d   :  { %711 = vmatpush3.bf16.msra.mxu0 %v708_v3  ;;  %692 = vmatprep.subr.mxu1 %v796_v13  ;;  %v78_v14 = vld [vmem:[%s1100_s1] sm:$0xff]  ;;  %s925_s15 = sld [smem:[#allocation3 + $0x4]]  ;;  %s927_s16 = sld [smem:[#allocation3 + $0x5]] }
  0x2e   :  { %693 = vmatpush3.msra.mxu1 %v78_v14  ;;  %694 = vmatprep.mubr.msk.f32.mxu1 %vm797_vm1, %v796_v13  ;;  %v210_v15 = vld [vmem:[%s1104_s5] sm:$0xff]  ;;  %s915_s5 = sld [smem:[#allocation3]]  ;;  %s929_s17 = sld [smem:[#allocation3 + $0x6]] }
  0x2f   :  { %104 = vperm.xlu1 %727, %v86_v10   ;;  %695 = vmatmul.mubr.msk.f32.vlgmr.msra.gmra.mrb[0].mxu1 %vm211_vm2, %v210_v15  ;;  %v209_v35 = vld [vmem:[%s1103_s4] sm:$0xff]  ;;  %s931_s4 = sld [smem:[#allocation3 + $0x7]]  ;;  %s933_s18 = sld [smem:[#allocation6 + $0x1]] }
  0x30   :  { %687 = vmatmul.mubr.msk.f32.vlgmr.msra.gmra.mrb[0].mxu0 %vm107_vm0, %v80_v7  ;;  %94 = vperm.xlu0 %726, %v84_v8   ;;  %s935_s19 = sld [smem:[#allocation3 + $0x80]]  ;;  %s937_s0 = sld [smem:[#allocation3 + $0x81]] }
  0x31   :  { %689 = vmatprep.mubr.msk.f32.mxu0 %vm107_vm0, %v81_v9  ;;  %712 = vmatprep.subr.bf16.mxu1 %v798_v16  ;;  %s939_s20 = sld [smem:[#allocation3 + $0x82]]  ;;  %s941_s21 = sld [smem:[#allocation3 + $0x83]]  ;;  %v383_v41 = vstv %s919_s9  ;;  %v390_v42 = vstv %s921_s13 }
  0x32   :  { %705 = vmatprep.mubr.msk.f32.mxu1 %vm797_vm1, %v796_v13  ;;  %s943_s22 = sld [smem:[#allocation3 + $0x84]]  ;;  %s945_s23 = sld [smem:[#allocation3 + $0x85]]  ;;  %v370_v39 = vstv %s923_s14  ;;  %v376_v40 = vstv %s917_s6 }
  0x33   :  { %s947_s24 = sld [smem:[#allocation3 + $0x86]]  ;;  %s949_s25 = sld [smem:[#allocation3 + $0x87]]  ;;  %v397_v44 = vstv %s925_s15  ;;  %v404_v45 = vstv %s927_s16 }
  0x34   :  { %690 = vmatmul.mubr.msk.f32.gmra.mrb[2].mxu0 %vm107_vm0, %v82_v11  ;;  %362 = vperm.xlu0 %726, %v359_v12   ;;  %s951_s8 = sld [smem:[#allocation3 + $0x100]]  ;;  %s953_s7 = sld [smem:[#allocation3 + $0x101]]  ;;  %v372_v38 = vstv %s915_s5  ;;  %v411_v46 = vstv %s929_s17 }
  0x35   :  { %s955_s26 = sld [smem:[#allocation6 + $0x2]]  ;;  %s959_s28 = sld [smem:[#allocation3 + $0x103]]  ;;  %v418_v47 = vstv %s931_s4  ;;  %v430_v50 = vstv %s933_s18 }
  0x36   :  { %s957_s27 = sld [smem:[#allocation3 + $0x102]]  ;;  %s961_s3 = sld [smem:[#allocation3 + $0x104]]  ;;  %v432_v51 = vstv %s935_s19  ;;  %v436_v52 = vstv %s937_s0 }
  0x37   :  { %s963_s29 = sld [smem:[#allocation3 + $0x105]]  ;;  %s965_s30 = sld [smem:[#allocation3 + $0x106]]  ;;  %v443_v54 = vstv %s939_s20  ;;  %v450_v55 = vstv %s941_s21 }
  0x38   :  { %s967_s12 = sld [smem:[#allocation3 + $0x107]]  ;;  %s969_s1 = sld [smem:[#allocation3 + $0x180]]  ;;  %v457_v56 = vstv %s943_s22  ;;  %v464_v57 = vstv %s945_s23 }
  0x39   :  { %s972_s2 = sld [smem:[#allocation3 + $0x181]]  ;;  %s974_s11 = sld [smem:[#allocation3 + $0x182]]  ;;  %v471_v59 = vstv %s947_s24  ;;  %v478_v60 = vstv %s949_s25 }
  0x3a   :  { %s980_s10 = sld [smem:[#allocation6 + $0x3]]  ;;  %s993_s6 = sld [smem:[#allocation3 + $0x185]]  ;;  %v492_v61 = vstv %s951_s8  ;;  %v496_v63 = vstv %s953_s7 }
  0x3b   :  { %s986_s5 = sld [smem:[#allocation3 + $0x183]]  ;;  %s995_s9 = sld [smem:[#allocation8]]  ;;  %v490_v62 = vstv %s955_s26  ;;  %v510_v1 = vstv %s959_s28 }
  0x3c   :  { %s1001_s13 = sld [smem:[#allocation3 + $0x186]]  ;;  %v503_v0 = vstv %s957_s27  ;;  %v517_v3 = vstv %s961_s3  ;;  %s1050_s15 = sld [smem:[#allocation8 + $0x1]] }
  0x3d   :  { %v524_v4 = vstv %s963_s29  ;;  %v531_v5 = vstv %s965_s30  ;;  %s1070_s16 = sld [smem:[#allocation8 + $0x2]]  ;;  %s1117_s4 = sld [smem:[#allocation14_spill]] }
  0x3e   :  { %v538_v6 = vstv %s967_s12  ;;  %v552_v7 = vstv %s969_s1  ;;  %s668_s18 = sld [smem:[#allocation8 + $0x3]]  ;;  %s799_s19 = smov [#allocation9]  }
  0x3f   :  { %1115 = sst [smem:[#allocation13_spill]] %s974_s11  ;;  %s988_s11 = sld [smem:[#allocation3 + $0x184]]  ;;  %v556_v8 = vstv %s972_s2 }
  0x40   :  { %s1116_s14 = sld [smem:[#allocation13_spill]]  ;;  %v550_v13 = vstv %s980_s10  ;;  %s1048_s10 = sld [smem:[#allocation3 + $0x187]] }
  0x41   :  { %s616_s0 = sshll.u32 %s799_s19, 4  ;;  %s617_s0 = int_to_ptr.vmem [resolvable:$true] %s616_s0 }
  0x42   :  { %s764_s20 = scalar_lea.vmem %s617_s0, 16  ;;  %s768_s21 = scalar_lea.vmem %s617_s0, 32 }
  0x43   :  { %p765_p1 = scmp.ne.s32.totalorder %s617_s0, %s764_s20  ;;  %p769_p2 = scmp.lt.s32.totalorder %s617_s0, %s617_s0 }
  0x44   :  { %p770_p3 = scmp.lt.s32.totalorder %s768_s21, %s764_s20 }
  0x46   :  { %v563_v9 = vstv %s1116_s14  ;;  %p771_p4 = por %p770_p3, %p769_p2 }
  0x48   :  { %p772_p5 = pnand %p771_p4, %p765_p1 }
  0xaa   :  { %v100_v18 = vpop.permute.xlu1 %99 }
  0xab   :  { %v90_v17 = vpop.permute.xlu0 %89 }
  0xae   :  { %v105_v25 = vpop.permute.xlu1 %104 }
  0xaf   :  { %v95_v19 = vpop.permute.xlu0 %94 }
  0xb3   :  { %v363_v53 = vpop.permute.xlu0 %362 }
 0x102   :  { %v281_v36 = vpop.f32.mrb[0].mxu1 }
 0x103   :  { %v688_v20 = vpop.f32.mrb[0].mxu0  ;;  %v696_v37 = vpop.f32.mrb[1].mxu1 }
 0x104   :  { %v192_v21 = vadd.f32 %v688_v20, %v95_v19  ;;  %v186_v22 = vpop.f32.mrb[1].mxu0 }
 0x105   :  { %v187_v23 = vadd.f32 %v186_v22, %v90_v17  ;;  %v577_v17 = vstv %s988_s11 }
 0x106   :  { %v206_v24 = vmax.f32 %v192_v21, 0.0  ;;  %v584_v21 = vstv %s993_s6 }
 0x107   :  { %v205_v26 = vmax.f32 %v187_v23, 0.0  ;;  %v691_v27 = vpop.f32.mrb[2].mxu0 }
 0x108   :  { %v202_v28 = vadd.f32 %v691_v27, %v105_v25  ;;  %v196_v29 = vpop.f32.mrb[3].mxu0  ;;  %v591_v25 = vstv %s1001_s13 }
 0x109   :  { %v713_v30 = vpack.c.bf16 %v206_v24, %v205_v26  ;;  %v197_v31 = vadd.f32 %v196_v29, %v100_v18  ;;  %v426_v24 = vstv %s995_s9 }
 0x10a   :  { %v208_v32 = vmax.f32 %v202_v28, 0.0 }
 0x10b   :  { %v207_v33 = vmax.f32 %v197_v31, 0.0  ;;  %714 = vmatpush3.bf16.msra.mxu1 %v713_v30 }
 0x10c   :  { %715 = vmatprep.subr.bf16.mxu1 %v798_v16  ;;  %v570_v16 = vstv %s986_s5 }
 0x10d   :  { %v716_v34 = vpack.c.bf16 %v208_v32, %v207_v33 }
 0x10f   :  { %717 = vmatpush3.bf16.msra.mxu1 %v716_v34 }
 0x112   :  { %706 = vmatmul.mubr.msk.f32.vlgmr.msra.gmra.mrb[2].mxu1 %vm285_vm3, %v209_v35 }
 0x1e5   :  { %v355_v43 = vpop.f32.mrb[2].mxu1 }
 0x1e6   :  { %v356_v48 = vadd.f32 %v355_v43, %v281_v36  ;;  %v707_v49 = vpop.f32.mrb[3].mxu1 }
 0x1e8   :  { %v365_v58 = vadd.f32 %v363_v53, %v356_v48 }
 0x1ea   :  { %v1010_v2 = vmax.f32 %v365_v58, 0.0 }
 0x1ec   :  { %v373_v10 = vmul.f32 %v372_v38, %v1010_v2  ;;  %v377_v11 = vmul.f32 %v376_v40, %v1010_v2  ;;  %v384_v12 = vmul.f32 %v383_v41, %v1010_v2  ;;  %v391_v14 = vmul.f32 %v390_v42, %v1010_v2 }
 0x1ed   :  { %v398_v15 = vmul.f32 %v397_v44, %v1010_v2  ;;  %v405_v20 = vmul.f32 %v404_v45, %v1010_v2  ;;  %v412_v23 = vmul.f32 %v411_v46, %v1010_v2  ;;  %v433_v27 = vmul.f32 %v432_v51, %v1010_v2 }
 0x1ee   :  { %v374_v18 = vadd.f32 %v373_v10, %v370_v39  ;;  %v379_v19 = vrot.slane %v377_v11, 1  ;;  %v386_v22 = vrot.slane %v384_v12, 2  ;;  %v437_v28 = vmul.f32 %v436_v52, %v1010_v2 }
 0x1ef   :  { %v444_v29 = vmul.f32 %v443_v54, %v1010_v2  ;;  %v393_v30 = vrot.slane %v391_v14, 3  ;;  %v400_v31 = vrot.slane %v398_v15, 4  ;;  %v419_v32 = vmul.f32 %v418_v47, %v1010_v2 }
 0x1f0   :  { %v381_v26 = vadd.f32 %v379_v19, %v374_v18  ;;  %v451_v33 = vmul.f32 %v450_v55, %v1010_v2  ;;  %v407_v35 = vrot.slane %v405_v20, 5  ;;  %v434_v36 = vadd.f32 %v433_v27, %v430_v50 }
 0x1f1   :  { %v439_v37 = vrot.slane %v437_v28, 1  ;;  %v414_v38 = vrot.slane %v412_v23, 6  ;;  %v458_v39 = vmul.f32 %v457_v56, %v1010_v2  ;;  %v465_v40 = vmul.f32 %v464_v57, %v1010_v2 }
 0x1f2   :  { %v388_v34 = vadd.f32 %v386_v22, %v381_v26  ;;  %v472_v41 = vmul.f32 %v471_v59, %v1010_v2  ;;  %v446_v44 = vrot.slane %v444_v29, 2  ;;  %v493_v45 = vmul.f32 %v492_v61, %v1010_v2 }
 0x1f3   :  { %v441_v43 = vadd.f32 %v439_v37, %v434_v36  ;;  %v453_v46 = vrot.slane %v451_v33, 3  ;;  %v479_v47 = vmul.f32 %v478_v60, %v1010_v2  ;;  %v497_v48 = vmul.f32 %v496_v63, %v1010_v2 }
 0x1f4   :  { %v395_v42 = vadd.f32 %v393_v30, %v388_v34  ;;  %v504_v49 = vmul.f32 %v503_v0, %v1010_v2  ;;  %v494_v52 = vadd.f32 %v493_v45, %v490_v62  ;;  %v511_v53 = vmul.f32 %v510_v1, %v1010_v2 }
 0x1f5   :  { %v448_v51 = vadd.f32 %v446_v44, %v441_v43  ;;  %v421_v54 = vrot.slane %v419_v32, 7  ;;  %v460_v55 = vrot.slane %v458_v39, 4  ;;  %v467_v56 = vrot.slane %v465_v40, 5 }
 0x1f6   :  { %v402_v50 = vadd.f32 %v400_v31, %v395_v42  ;;  %v499_v57 = vrot.slane %v497_v48, 1  ;;  %v474_v61 = vrot.slane %v472_v41, 6  ;;  %v518_v10 = vmul.f32 %v517_v3, %v1010_v2 }
 0x1f7   :  { %v455_v59 = vadd.f32 %v453_v46, %v448_v51  ;;  %v506_v63 = vrot.slane %v504_v49, 2  ;;  %v553_v0 = vmul.f32 %v552_v7, %v1010_v2  ;;  %v557_v62 = vmul.f32 %v556_v8, %v1010_v2 }
 0x1f8   :  { %v409_v58 = vadd.f32 %v407_v35, %v402_v50  ;;  %v501_v60 = vadd.f32 %v499_v57, %v494_v52  ;;  %v481_v12 = vrot.slane %v479_v47, 7  ;;  %v513_v14 = vrot.slane %v511_v53, 3 }
 0x1f9   :  { %v462_v11 = vadd.f32 %v460_v55, %v455_v59  ;;  %v525_v3 = vmul.f32 %v524_v4, %v1010_v2  ;;  %v554_v18 = vadd.f32 %v553_v0, %v550_v13  ;;  %v559_v19 = vrot.slane %v557_v62, 1 }
 0x1fa   :  { %v416_v1 = vadd.f32 %v414_v38, %v409_v58  ;;  %v508_v15 = vadd.f32 %v506_v63, %v501_v60  ;;  %v564_v20 = vmul.f32 %v563_v9, %v1010_v2  ;;  %v571_v22 = vmul.f32 %v570_v16, %v1010_v2 }
 0x1fb   :  { %v469_v8 = vadd.f32 %v467_v56, %v462_v11  ;;  %v520_v26 = vrot.slane %v518_v10, 4  ;;  %v532_v27 = vmul.f32 %v531_v5, %v1010_v2  ;;  %v561_v28 = vadd.f32 %v559_v19, %v554_v18 }
 0x1fc   :  { %v423_v7 = vadd.f32 %v421_v54, %v416_v1  ;;  %v515_v23 = vadd.f32 %v513_v14, %v508_v15  ;;  %v566_v29 = vrot.slane %v564_v20, 2  ;;  %v578_v30 = vmul.f32 %v577_v17, %v1010_v2 }
 0x1fd   :  { %v476_v13 = vadd.f32 %v474_v61, %v469_v8  ;;  %v527_v32 = vrot.slane %v525_v3, 5  ;;  %v539_v9 = vmul.f32 %v538_v6, %v1010_v2  ;;  %v585_v5 = vmul.f32 %v584_v21, %v1010_v2 }
 0x1fe   :  { %v425_v4 = vmax.f32 %v423_v7, 0.0  ;;  %v522_v31 = vadd.f32 %v520_v26, %v515_v23  ;;  %v568_v34 = vadd.f32 %v566_v29, %v561_v28  ;;  %v573_v35 = vrot.slane %v571_v22, 3 }
 0x1ff   :  { %v483_v33 = vadd.f32 %v481_v12, %v476_v13  ;;  %v368_v17 = vstv %s1117_s4  ;;  %v534_v37 = vrot.slane %v532_v27, 6  ;;  %v598_v38 = vstv %s1048_s10 }
 0x200   :  { %v427_v16 = vmul.f32 %v426_v24, %v425_v4  ;;  %v529_v36 = vadd.f32 %v527_v32, %v522_v31  ;;  %v575_v40 = vadd.f32 %v573_v35, %v568_v34  ;;  %v580_v6 = vrot.slane %v578_v30, 4 }
 0x201   :  { %v485_v39 = vmax.f32 %v483_v33, 0.0  ;;  %v592_v41 = vmul.f32 %v591_v25, %v1010_v2  ;;  %v486_v21 = vstv %s1050_s15  ;;  %v541_v24 = vrot.slane %v539_v9, 7 }
 0x202   :  { %v536_v42 = vadd.f32 %v534_v37, %v529_v36  ;;  %v428_v43 = vadd.f32 %v427_v16, %v368_v17  ;;  %v582_v44 = vadd.f32 %v580_v6, %v575_v40  ;;  %v587_v45 = vrot.slane %v585_v5, 5 }
 0x203   :  { %v599_v46 = vmul.f32 %v598_v38, %v1010_v2  ;;  %v487_v48 = vmul.f32 %v486_v21, %v485_v39  ;;  %v594_v50 = vrot.slane %v592_v41, 6  ;;  %v546_v52 = vstv %s1070_s16 }
 0x204   :  { %v543_v47 = vadd.f32 %v541_v24, %v536_v42  ;;  %v589_v49 = vadd.f32 %v587_v45, %v582_v44  ;;  %v606_v57 = vstv %s668_s18 }
 0x205   :  { %v488_v53 = vadd.f32 %v487_v48, %v428_v43  ;;  %v601_v55 = vrot.slane %v599_v46, 7 }
 0x206   :  { %v545_v51 = vmax.f32 %v543_v47, 0.0  ;;  %v596_v54 = vadd.f32 %v594_v50, %v589_v49 }
 0x208   :  { %v547_v56 = vmul.f32 %v546_v52, %v545_v51  ;;  %v603_v25 = vadd.f32 %v601_v55, %v596_v54 }
 0x20a   :  { %v548_v58 = vadd.f32 %v547_v56, %v488_v53  ;;  %v605_v59 = vmax.f32 %v603_v25, 0.0 }
 0x20c   :  { %v607_v61 = vmul.f32 %v606_v57, %v605_v59 }
 0x20e   :  { %v608_v10 = vadd.f32 %v607_v61, %v548_v58 }
 0x210   :  { %609 = vst [vmem:[#allocation9] sm:$0x1] %v608_v10 }
 0x211   :  { %775 = shalt.err (!%p772_p5)
}
 0x212   :  { %s1118_s24 = sld [smem:[#allocation15_spill]] }
 0x218   :  { %s776_s25 = scalar_lea.hbm %s1118_s24, 16 }
 0x219   :  { %p777_p6 = scmp.ne.s32.totalorder %s1118_s24, %s776_s25  ;;  %p780_p7 = scmp.lt.u32.totalorder %s776_s25, %s1118_s24 }
 0x21b   :  { %p782_p8 = pnand %p780_p7, %p777_p6 }
 0x21d   :  { %785 = shalt.err (!%p782_p8)
}
 0x21e   :  { %619 = dma.vmem_to_hbm [thread:$0]  %s617_s0, 16, %s1118_s24, [#allocation4]  }
 0x21f   :  { %790 = dma.done.wait [#allocation4], 16  }
 0x220   :  { %791 = vsyncadd [#allocation4], 4294967280 }
 0x221   :  { %623 = vsyncpa [#allocation4], 1 }
 0x222   :  { %624 = vsyncpa [#allocation5], 1 }
 0x223   :  { %625 = vsyncpa [#allocation7], 1 }

</bundles_post_ra>
